<compile_context>
chip_gen: v7x
topology: tpu7x:2x2x1
jax: 0.10.0
libtpu: 0.0.40
codegen_flags: <defaults>
</compile_context>

<pallas_src>
import functools

import jax
import jax.numpy as jnp
from jax.experimental import pallas as pl
from jax.experimental.pallas import tpu as pltpu


def _round_up(x, n):
    return ((x + n - 1) // n) * n


def _c2p_ln_kernel(x_ref, w_ref, b_ref, g_ref, beta_ref, o_ref, *,
                   group, embed_pad, inv_n, eps, compute_dtype):
    """One (tm, group*embed_pad) output block: Linear chunk + per-group LayerNorm."""
    x = x_ref[...]
    w = w_ref[...]
    if compute_dtype is not None and x.dtype != compute_dtype:
        x = x.astype(compute_dtype)
    if compute_dtype is not None and w.dtype != compute_dtype:
        w = w.astype(compute_dtype)

    # Padded W/bias columns are zero, so y == 0 there and the reductions below
    # (divided by the true embed_dim via inv_n) are exact.
    y = jnp.dot(x, w, preferred_element_type=jnp.float32) + b_ref[...]

    gamma = g_ref[...]        # (1, embed_pad) f32
    betap = beta_ref[...]     # (1, embed_pad) f32
    for g in range(group):    # static, tiny (<= 4) unrolled loop; 128-aligned slices
        lo = g * embed_pad
        seg = y[:, lo:lo + embed_pad]
        s1 = jnp.sum(seg, axis=-1, keepdims=True)
        s2 = jnp.sum(seg * seg, axis=-1, keepdims=True)
        mean = s1 * inv_n
        var = jnp.maximum(s2 * inv_n - mean * mean, 0.0)   # clamp cancellation noise
        yn = (seg - mean) * jax.lax.rsqrt(var + eps)       # rsqrt -> EUP slot
        o_ref[:, lo:lo + embed_pad] = (yn * gamma + betap).astype(o_ref.dtype)


def code_to_prompt(code, w, bias, gamma, beta, *, num_per_slot, embed_dim,
                   eps=1e-5, compute_dtype=None, out_dtype=None):
    """Fused c2p Linear + rearrange + LayerNorm.

    code  : (b, k, code_dim)
    w     : (code_dim, num_per_slot*embed_dim)
    bias  : (num_per_slot*embed_dim,)
    gamma, beta : (embed_dim,)
    compute_dtype : optional in-kernel cast for the matmul operands (e.g. bf16);
                    None keeps the stored dtype (f32 parity with PyTorch Linear).
    out_dtype     : output dtype (default: code.dtype).
    returns (b, k*num_per_slot, embed_dim).
    """
    b, k, code_dim = code.shape
    m = b * k
    n_out = num_per_slot * embed_dim
    assert w.shape == (code_dim, n_out)
    out_dtype = code.dtype if out_dtype is None else out_dtype

    # ---- column padding: every LayerNorm group becomes a 128-multiple wide ----
    embed_pad = _round_up(embed_dim, 128)
    if embed_pad != embed_dim:
        # Params are tiny; callers reusing the module should pre-pad/cache once.
        w_p = jnp.pad(w.reshape(code_dim, num_per_slot, embed_dim),
                      ((0, 0), (0, 0), (0, embed_pad - embed_dim)))
        w_p = w_p.reshape(code_dim, num_per_slot * embed_pad)
        b_p = jnp.pad(bias.reshape(num_per_slot, embed_dim),
                      ((0, 0), (0, embed_pad - embed_dim))).reshape(-1)
        g_p = jnp.pad(gamma, (0, embed_pad - embed_dim))
        be_p = jnp.pad(beta, (0, embed_pad - embed_dim))
    else:
        w_p, b_p, g_p, be_p = w, bias, gamma, beta
    n_pad = num_per_slot * embed_pad

    bias2d = b_p.reshape(1, n_pad).astype(jnp.float32)
    gamma2d = g_p.reshape(1, embed_pad).astype(jnp.float32)
    beta2d = be_p.reshape(1, embed_pad).astype(jnp.float32)

    # ---- pack small LN groups so output blocks are >= ~512 lanes wide ----
    group = 1
    max_group = max(1, 512 // embed_pad)
    for cand in range(min(num_per_slot, max_group), 0, -1):
        if num_per_slot % cand == 0:
            group = cand
            break
    tn = group * embed_pad
    num_chunks = num_per_slot // group

    x2d = code.reshape(m, code_dim)
    x_bytes = jnp.dtype(x2d.dtype).itemsize
    w_bytes = jnp.dtype(w_p.dtype).itemsize
    o_bytes = jnp.dtype(out_dtype).itemsize

    # ---- VMEM-budgeted row tile (double-buffered blocks + f32 intermediate) ----
    budget = 24 * 1024 * 1024
    fixed = 2 * (code_dim * tn * w_bytes + tn * 4) + 4 * embed_pad * 4
    per_row = 2 * (code_dim * x_bytes + tn * o_bytes) + tn * 4
    tm = max(8, min(1024, ((budget - fixed) // per_row) // 8 * 8))
    tm = min(tm, _round_up(m, 8))
    grid_rows = pl.cdiv(m, tm)
    # Guarantee >= 2 grid steps when possible so both v7x TensorCores get work.
    if num_chunks * grid_rows < 2 and m > 8:
        tm = _round_up(pl.cdiv(m, 2), 8)
        grid_rows = pl.cdiv(m, tm)

    m_pad = grid_rows * tm
    if m_pad != m:
        x2d = jnp.pad(x2d, ((0, m_pad - m), (0, 0)))

    need = fixed + tm * per_row
    vmem_limit = int(min(48 * 1024 * 1024, max(32 * 1024 * 1024, need + 4 * 1024 * 1024)))

    cost = pl.CostEstimate(
        flops=2 * m_pad * code_dim * n_pad,
        transcendentals=m * num_per_slot,
        bytes_accessed=(num_chunks * m_pad * code_dim * x_bytes   # x re-read per W chunk
                        + code_dim * n_pad * w_bytes              # W streamed exactly once
                        + n_pad * 4 + 2 * embed_pad * 4
                        + m_pad * n_pad * o_bytes),
    )

    kernel = functools.partial(_c2p_ln_kernel, group=group, embed_pad=embed_pad,
                               inv_n=1.0 / embed_dim, eps=eps,
                               compute_dtype=compute_dtype)

    out2d = pl.pallas_call(
        kernel,
        out_shape=jax.ShapeDtypeStruct((m_pad, n_pad), out_dtype),
        grid_spec=pl.GridSpec(
            # Chunk axis OUTER, row axis INNER (fastest-varying): each W chunk is
            # DMA'd once and kept resident while row tiles stream past it.
            grid=(num_chunks, grid_rows),
            in_specs=[
                pl.BlockSpec((tm, code_dim), lambda c, i: (i, 0)),
                pl.BlockSpec((code_dim, tn), lambda c, i: (0, c)),
                pl.BlockSpec((1, tn), lambda c, i: (0, c)),
                pl.BlockSpec((1, embed_pad), lambda c, i: (0, 0)),
                pl.BlockSpec((1, embed_pad), lambda c, i: (0, 0)),
            ],
            out_specs=pl.BlockSpec((tm, tn), lambda c, i: (i, c)),
        ),
        compiler_params=pltpu.CompilerParams(
            dimension_semantics=("parallel", "parallel"),
            vmem_limit_bytes=vmem_limit),
        cost_estimate=cost,
    )(x2d, w_p, bias2d, gamma2d, beta2d)

    out2d = out2d[:m]
    if embed_pad != embed_dim:
        out3 = out2d.reshape(m, num_per_slot, embed_pad)[:, :, :embed_dim]
        return out3.reshape(b, k * num_per_slot, embed_dim)
    return out2d.reshape(b, k * num_per_slot, embed_dim)


def _reference(code, w, bias, gamma, beta, num_per_slot, embed_dim, eps=1e-5):
    b, k, _ = code.shape
    y = jnp.einsum("bkc,cn->bkn", code.astype(jnp.float32), w.astype(jnp.float32),
                   preferred_element_type=jnp.float32) + bias
    y = y.reshape(b, k * num_per_slot, embed_dim)
    mean = y.mean(-1, keepdims=True)
    var = ((y - mean) ** 2).mean(-1, keepdims=True)
    return (y - mean) / jnp.sqrt(var + eps) * gamma + beta


if __name__ == "__main__":
    key = jax.random.PRNGKey(0)
    k_code, k_w, k_b = jax.random.split(key, 3)

    # ---- case 1: lane-aligned embed_dim (fast path, packed groups) ----
    b, k = 2, 8
    code_dim, num_per_slot, embed_dim = 32, 2, 128
    code = jax.random.normal(k_code, (b, k, code_dim), dtype=jnp.float32)
    bound = 1.0 / (code_dim ** 0.5)
    w = jax.random.uniform(k_w, (code_dim, num_per_slot * embed_dim),
                           dtype=jnp.float32, minval=-bound, maxval=bound)
    bias = jax.random.uniform(k_b, (num_per_slot * embed_dim,),
                              dtype=jnp.float32, minval=-bound, maxval=bound)
    gamma = jnp.ones((embed_dim,), jnp.float32)   # nn.LayerNorm defaults
    beta = jnp.zeros((embed_dim,), jnp.float32)

    out = code_to_prompt(code, w, bias, gamma, beta,
                         num_per_slot=num_per_slot, embed_dim=embed_dim)
    out = jax.block_until_ready(out)
    assert out.shape == (b, k * num_per_slot, embed_dim)
    ref = _reference(code, w, bias, gamma, beta, num_per_slot, embed_dim)
    assert jnp.allclose(out, ref, atol=2e-3, rtol=2e-3), \
        float(jnp.max(jnp.abs(out - ref)))

    # ---- case 2: unaligned embed_dim exercises the column-padding path ----
    embed_dim2 = 96
    w2 = jax.random.uniform(k_w, (code_dim, num_per_slot * embed_dim2),
                            dtype=jnp.float32, minval=-bound, maxval=bound)
    bias2 = jax.random.uniform(k_b, (num_per_slot * embed_dim2,),
                               dtype=jnp.float32, minval=-bound, maxval=bound)
    gamma2 = jnp.ones((embed_dim2,), jnp.float32)
    beta2 = jnp.zeros((embed_dim2,), jnp.float32)
    out2 = code_to_prompt(code, w2, bias2, gamma2, beta2,
                          num_per_slot=num_per_slot, embed_dim=embed_dim2)
    out2 = jax.block_until_ready(out2)
    assert out2.shape == (b, k * num_per_slot, embed_dim2)
    ref2 = _reference(code, w2, bias2, gamma2, beta2, num_per_slot, embed_dim2)
    assert jnp.allclose(out2, ref2, atol=2e-3, rtol=2e-3), \
        float(jnp.max(jnp.abs(out2 - ref2)))

    # TODO(synk): use_sa (TransformerEncoderLayer) / use_mlp branches and the
    # training-only EMA running_prompt update are not part of the default eval
    # forward path and are not implemented here.
    print("KERNEL_OK")
</pallas_src>

<mosaic_0001>
module attributes {stable_mosaic.version = 11 : i64} {
  func.func @_c2p_ln_kernel(%arg0: i32, %arg1: i32, %arg2: memref<8x32xf32, #tpu.memory_space<vmem>>, %arg3: memref<32x256xf32, #tpu.memory_space<vmem>>, %arg4: memref<1x256xf32, #tpu.memory_space<vmem>>, %arg5: memref<1x128xf32, #tpu.memory_space<vmem>>, %arg6: memref<1x128xf32, #tpu.memory_space<vmem>>, %arg7: memref<8x256xf32, #tpu.memory_space<vmem>>) attributes {dimension_semantics = [#tpu.dimension_semantics<parallel>, #tpu.dimension_semantics<parallel>], iteration_bounds = array<i64: 1, 2>, scalar_prefetch = 0 : i64, scratch_operands = 0 : i64, tpu.core_type = #tpu.core_type<tc>, window_params = [{transform_indices = @transform_0, window_bounds = array<i64: 8, 32>}, {transform_indices = @transform_1, window_bounds = array<i64: 32, 256>}, {transform_indices = @transform_2, window_bounds = array<i64: 1, 256>}, {pipeline_mode = #tpu.pipeline_mode<synchronous>, transform_indices = @transform_3, window_bounds = array<i64: 1, 128>}, {pipeline_mode = #tpu.pipeline_mode<synchronous>, transform_indices = @transform_4, window_bounds = array<i64: 1, 128>}, {transform_indices = @transform_5, window_bounds = array<i64: 8, 256>}]} {
    %c0 = arith.constant 0 : index
    %c0_0 = arith.constant 0 : index
    %0 = vector.load %arg2[%c0, %c0_0] : memref<8x32xf32, #tpu.memory_space<vmem>>, vector<8x32xf32>
    %c0_1 = arith.constant 0 : index
    %c0_2 = arith.constant 0 : index
    %1 = vector.load %arg3[%c0_1, %c0_2] : memref<32x256xf32, #tpu.memory_space<vmem>>, vector<32x256xf32>
    %cst = arith.constant dense<0.000000e+00> : vector<8x256xf32>
    %2 = tpu.matmul %0, %1, %cst {dimension_numbers = #tpu.dot_dimension_numbers<[1], [0], [0], [1], [0, 0, 1, 1], [], []>} : vector<8x32xf32>, vector<32x256xf32>, vector<8x256xf32> -> vector<8x256xf32>
    %c0_3 = arith.constant 0 : index
    %c0_4 = arith.constant 0 : index
    %3 = vector.load %arg4[%c0_3, %c0_4] : memref<1x256xf32, #tpu.memory_space<vmem>>, vector<1x256xf32>
    %4 = vector.broadcast %3 : vector<1x256xf32> to vector<8x256xf32>
    %5 = arith.addf %2, %4 : vector<8x256xf32>
    %c0_5 = arith.constant 0 : index
    %c0_6 = arith.constant 0 : index
    %6 = vector.load %arg5[%c0_5, %c0_6] : memref<1x128xf32, #tpu.memory_space<vmem>>, vector<1x128xf32>
    %c0_7 = arith.constant 0 : index
    %c0_8 = arith.constant 0 : index
    %7 = vector.load %arg6[%c0_7, %c0_8] : memref<1x128xf32, #tpu.memory_space<vmem>>, vector<1x128xf32>
    %8 = vector.extract_strided_slice %5 {offsets = [0, 0], sizes = [8, 128], strides = [1, 1]} : vector<8x256xf32> to vector<8x128xf32>
    %cst_9 = arith.constant dense<0.000000e+00> : vector<8xf32>
    %9 = vector.multi_reduction <add>, %8, %cst_9 [1] : vector<8x128xf32> to vector<8xf32>
    %10 = vector.shape_cast %9 : vector<8xf32> to vector<8x1xf32>
    %11 = arith.mulf %8, %8 : vector<8x128xf32>
    %cst_10 = arith.constant dense<0.000000e+00> : vector<8xf32>
    %12 = vector.multi_reduction <add>, %11, %cst_10 [1] : vector<8x128xf32> to vector<8xf32>
    %13 = vector.shape_cast %12 : vector<8xf32> to vector<8x1xf32>
    %cst_11 = arith.constant 7.812500e-03 : f32
    %14 = vector.broadcast %cst_11 : f32 to vector<8x1xf32>
    %15 = arith.mulf %10, %14 : vector<8x1xf32>
    %cst_12 = arith.constant 7.812500e-03 : f32
    %16 = vector.broadcast %cst_12 : f32 to vector<8x1xf32>
    %17 = arith.mulf %13, %16 : vector<8x1xf32>
    %18 = arith.mulf %15, %15 : vector<8x1xf32>
    %19 = arith.subf %17, %18 : vector<8x1xf32>
    %cst_13 = arith.constant 0.000000e+00 : f32
    %20 = vector.broadcast %cst_13 : f32 to vector<8x1xf32>
    %21 = arith.maximumf %19, %20 : vector<8x1xf32>
    %22 = vector.broadcast %15 : vector<8x1xf32> to vector<8x128xf32>
    %23 = arith.subf %8, %22 : vector<8x128xf32>
    %cst_14 = arith.constant 9.99999974E-6 : f32
    %24 = vector.broadcast %cst_14 : f32 to vector<8x1xf32>
    %25 = arith.addf %21, %24 : vector<8x1xf32>
    %26 = math.rsqrt %25 : vector<8x1xf32>
    %27 = vector.broadcast %26 : vector<8x1xf32> to vector<8x128xf32>
    %28 = arith.mulf %23, %27 : vector<8x128xf32>
    %29 = vector.broadcast %6 : vector<1x128xf32> to vector<8x128xf32>
    %30 = arith.mulf %28, %29 : vector<8x128xf32>
    %31 = vector.broadcast %7 : vector<1x128xf32> to vector<8x128xf32>
    %32 = arith.addf %30, %31 : vector<8x128xf32>
    %c0_15 = arith.constant 0 : index
    %c0_16 = arith.constant 0 : index
    %33 = vector.load %arg7[%c0_15, %c0_16] : memref<8x256xf32, #tpu.memory_space<vmem>>, vector<8x128xf32>
    tpu.vector_store %arg7[%c0_15, %c0_16], %32 {strides = array<i32>} : memref<8x256xf32, #tpu.memory_space<vmem>>, vector<8x128xf32>,
    %34 = vector.extract_strided_slice %5 {offsets = [0, 128], sizes = [8, 128], strides = [1, 1]} : vector<8x256xf32> to vector<8x128xf32>
    %cst_17 = arith.constant dense<0.000000e+00> : vector<8xf32>
    %35 = vector.multi_reduction <add>, %34, %cst_17 [1] : vector<8x128xf32> to vector<8xf32>
    %36 = vector.shape_cast %35 : vector<8xf32> to vector<8x1xf32>
    %37 = arith.mulf %34, %34 : vector<8x128xf32>
    %cst_18 = arith.constant dense<0.000000e+00> : vector<8xf32>
    %38 = vector.multi_reduction <add>, %37, %cst_18 [1] : vector<8x128xf32> to vector<8xf32>
    %39 = vector.shape_cast %38 : vector<8xf32> to vector<8x1xf32>
    %cst_19 = arith.constant 7.812500e-03 : f32
    %40 = vector.broadcast %cst_19 : f32 to vector<8x1xf32>
    %41 = arith.mulf %36, %40 : vector<8x1xf32>
    %cst_20 = arith.constant 7.812500e-03 : f32
    %42 = vector.broadcast %cst_20 : f32 to vector<8x1xf32>
    %43 = arith.mulf %39, %42 : vector<8x1xf32>
    %44 = arith.mulf %41, %41 : vector<8x1xf32>
    %45 = arith.subf %43, %44 : vector<8x1xf32>
    %cst_21 = arith.constant 0.000000e+00 : f32
    %46 = vector.broadcast %cst_21 : f32 to vector<8x1xf32>
    %47 = arith.maximumf %45, %46 : vector<8x1xf32>
    %48 = vector.broadcast %41 : vector<8x1xf32> to vector<8x128xf32>
    %49 = arith.subf %34, %48 : vector<8x128xf32>
    %cst_22 = arith.constant 9.99999974E-6 : f32
    %50 = vector.broadcast %cst_22 : f32 to vector<8x1xf32>
    %51 = arith.addf %47, %50 : vector<8x1xf32>
    %52 = math.rsqrt %51 : vector<8x1xf32>
    %53 = vector.broadcast %52 : vector<8x1xf32> to vector<8x128xf32>
    %54 = arith.mulf %49, %53 : vector<8x128xf32>
    %55 = vector.broadcast %6 : vector<1x128xf32> to vector<8x128xf32>
    %56 = arith.mulf %54, %55 : vector<8x128xf32>
    %57 = vector.broadcast %7 : vector<1x128xf32> to vector<8x128xf32>
    %58 = arith.addf %56, %57 : vector<8x128xf32>
    %c0_23 = arith.constant 0 : index
    %c128 = arith.constant 128 : index
    %59 = vector.load %arg7[%c0_23, %c128] : memref<8x256xf32, #tpu.memory_space<vmem>>, vector<8x128xf32>
    tpu.vector_store %arg7[%c0_23, %c128], %58 {strides = array<i32>} : memref<8x256xf32, #tpu.memory_space<vmem>>, vector<8x128xf32>,
    return
  }
  func.func @transform_0(%arg0: i32, %arg1: i32) -> (i32, i32) {
    %c0_i32 = arith.constant 0 : i32
    %c0_i32_0 = arith.constant 0 : i32
    return %arg1, %c0_i32 : i32, i32
  }
  func.func @transform_1(%arg0: i32, %arg1: i32) -> (i32, i32) {
    %c0_i32 = arith.constant 0 : i32
    %c0_i32_0 = arith.constant 0 : i32
    return %c0_i32, %arg0 : i32, i32
  }
  func.func @transform_2(%arg0: i32, %arg1: i32) -> (i32, i32) {
    %c0_i32 = arith.constant 0 : i32
    %c0_i32_0 = arith.constant 0 : i32
    return %c0_i32, %arg0 : i32, i32
  }
  func.func @transform_3(%arg0: i32, %arg1: i32) -> (i32, i32) {
    %c0_i32 = arith.constant 0 : i32
    %c0_i32_0 = arith.constant 0 : i32
    %c0_i32_1 = arith.constant 0 : i32
    return %c0_i32, %c0_i32_0 : i32, i32
  }
  func.func @transform_4(%arg0: i32, %arg1: i32) -> (i32, i32) {
    %c0_i32 = arith.constant 0 : i32
    %c0_i32_0 = arith.constant 0 : i32
    %c0_i32_1 = arith.constant 0 : i32
    return %c0_i32, %c0_i32_0 : i32, i32
  }
  func.func @transform_5(%arg0: i32, %arg1: i32) -> (i32, i32) {
    %c0_i32 = arith.constant 0 : i32
    return %arg1, %arg0 : i32, i32
  }
}

</mosaic_0001>

<bundles_post_ra>
// kernel: tpu_custom_call.1
= control target key start
LH: loop header
LB: loop body
LE: loop exit
PB: predicated region body
PF: predicated region fallthrough
CT: control target
= control target key end

     0   :  { %10 = vsyncpa [#allocation3], 0  ;;  %s1079_s0 = inlined_call_operand.hbm [shape: f32[16,32], index: 0, kind: input, shape index: {}]   ;;  %s1080_s1 = inlined_call_operand.hbm [shape: f32[32,256], index: 1, kind: input, shape index: {}]   ;;  %s1081_s2 = inlined_call_operand.vmem [shape: f32[1,256], index: 2, kind: input, shape index: {}]   ;;  %s1082_s3 = inlined_call_operand.vmem [shape: f32[1,128], index: 3, kind: input, shape index: {}]   ;;  %s1083_s4 = inlined_call_operand.vmem [shape: f32[1,128], index: 4, kind: input, shape index: {}]   ;;  %s1084_s5 = inlined_call_operand.hbm [shape: f32[16,256], index: 5, kind: output, shape index: {}]  }
   0x1   :  { %12 = vsyncpa [#allocation3 + $0x1], 0 }
   0x2   :  { %13 = vsyncpa [#allocation6], 0 }
   0x3   :  { %14 = vsyncpa [#allocation4], 0 }
   0x4   :  { %16 = vsyncpa [#allocation4 + $0x1], 0  ;;  %s855_s18 = smov 0   ;;  %s857_s19 = smov 0  }
   0x5   :  { %s859_s20 = smov 0   ;;  %s861_s21 = smov 0  }
   0x6   :  { %s863_s22 = smov 0   ;;  %s865_s23 = smov 0  }
   0x7 LB: > { %s564_s24 = sadd.s32 4294967295, %s817_s23   ;;  %s565_s25 = sadd.s32 4294967294, %s817_s23   ;;  %s817_s23 = sphi %s865_s23, %s22_s23   ;;  %s813_s22 = sphi %s863_s22, %s1108_s22   ;;  %s809_s21 = sphi %s861_s21, %s1107_s21   ;;  %s805_s20 = sphi %s859_s20, %s1106_s20   ;;  %s801_s19 = sphi %s857_s19, %s1105_s19   ;;  %s797_s18 = sphi %s855_s18, %s1104_s18  }
   0x8   : > { %p54_p0 = scmp.ne.s32.totalorder %s801_s19, %s797_s18  ;;  %p889_p1 = scmp.eq.s32.totalorder %s564_s24, 0 }
   0x9   : > { %p893_p2 = scmp.eq.s32.totalorder %s564_s24, 1  ;;  %p180_p3 = scmp.eq.s32.totalorder %s565_s25, 1 }
   0xa   : > { %s1089_s26 = scalar_select %p889_p1, 1, 0 }
   0xb   : > { %s1090_s27 = scalar_select %p893_p2, 1, 0 }
   0xc   : > { %p899_p4 = por %p889_p1, %p54_p0  ;;  %p566_p5 = scmp.ge.s32.totalorder %s817_s23, 1 }
   0xd   : > { %p904_p6 = por %p180_p3, %p54_p0  ;;  %p187_p7 = scmp.lt.s32.totalorder %s817_s23, 3 }
   0xe   : > { %s1091_s28 = scalar_select %p899_p4, 1, 0 }
   0xf   : > { %s1092_s29 = scalar_select %p904_p6, 1, 0 }
  0x10   : > { %p909_p8 = pnand %p566_p5, %p187_p7  ;;  %s819_s6 = smov [#allocation5]  }
  0x11   : > { %s202_s7 = sshll.u32 %s819_s6, 4  ;;  %s31_s9 = sadd.s32 1, %s813_s22  ;;  %s203_s7 = int_to_ptr.vmem [resolvable:$true] %s202_s7 }
  0x12   : > { %s1093_s30 = scalar_select %p909_p8, 1, 0 }
  0x13   : > { %p601_p9 = pneg %p909_p8  ;;  %s673_s12 = scalar_lea.hbm %s1080_s1, 1024 }
  0x14   : > { %p674_p12 = scmp.ne.s32.totalorder %s1080_s1, %s673_s12  ;;  %p680_p5 = scmp.lt.u32.totalorder %s673_s12, %s1080_s1 }
  0x15   : > { %p918_p11 = pnand %p601_p9, %p889_p1 }
  0x17   : > { %p675_p13 = pneg %p918_p11 }
  0x19   : > { %p676_p0 = pnand %p675_p13, %p674_p12 }
  0x1b   : > { %p677_p3 = pneg %p676_p0 }
  0x1d   : > { %p682_p7 = pnand %p680_p5, %p677_p3 }
  0x1f   : > { %685 = shalt.err (!%p682_p7)
}
  0x20   : > { %s686_s17 = scalar_lea.vmem %s203_s7, 1024  ;;  %p694_p1 = scmp.lt.s32.totalorder %s203_s7, %s203_s7 }
  0x21   : > { %p687_p9 = scmp.ne.s32.totalorder %s203_s7, %s686_s17  ;;  %p695_p4 = scmp.lt.s32.totalorder %s686_s17, %s686_s17 }
  0x23   : > { %p689_p10 = pnand %p687_p9, %p675_p13  ;;  %p696_p8 = por %p695_p4, %p694_p1 }
  0x25   : > { %p690_p6 = pneg %p689_p10 }
  0x27   : > { %p697_p2 = pnand %p696_p8, %p690_p6 }
  0x29   : > { %700 = shalt.err (!%p697_p2)
}
  0x2a   : > { %s820_s24 = smov 256   ;;  %s821_s25 = smov 16  }
  0x2b   : > { %604 = dma.hbm_to_vmem [thread:$0]  (!%p918_p11), %s1080_s1, 1024, %s203_s7, [#allocation6], %s820_s24, %s820_s24, %s821_s25  }
  0x2c   : > { %p32_p1 = scmp.ge.s32.totalorder %s31_s9, 2  ;;  %s41_s11 = sadd.s32 1, %s805_s20 }
  0x2d   : > { %p48_p2 = scmp.ne.s32.totalorder %s805_s20, %s801_s19  ;;  %p49_p4 = scmp.eq.s32.totalorder %s817_s23, 0 }
  0x2e   : > { %s1110_s9 = smov (%p32_p1, %s31_s9), 0  ;;  %p1096_p8 = scmp.ne.s32.totalorder %s1090_s27, 0 }
  0x2f   : > { %p945_p6 = por %p49_p4, %p48_p2  ;;  %s38_s8 = ssub.s32 %s813_s22, %s1110_s9 }
  0x30   : > { %p951_p10 = por %p1096_p8, %p48_p2  ;;  %p614_p12 = scmp.lt.s32.totalorder %s817_s23, 2 }
  0x31   : > { %p39_p11 = scmp.eq.s32.totalorder %s38_s8, 0  ;;  %s230_s7 = sand.u32 1, %s805_s20  }
  0x32   : > { %s570_s14 = sshll.u32 %s230_s7, 3  ;;  %s571_s16 = sshll.u32 %s813_s22, 7 }
  0x33   : > { %s960_s15 = scalar_select %p39_p11, %s805_s20, %s41_s11  }
  0x34   : > { %s966_s25 = scalar_lea.hbm %s1079_s0, %s571_s16  ;;  %s234_s27 = scalar_lea.vmem [#allocation2], %s570_s14 }
  0x35   : > { %s241_s6 = sshll.u32 %s234_s27, 4  ;;  %p972_p13 = pnand %p614_p12, %p945_p6  ;;  %s968_s6 = int_to_ptr.vmem [resolvable:$true] %s241_s6 }
  0x36   : > { %s231_s11 = scalar_lea.sflag [#allocation3], %s230_s7  ;;  %s701_s8 = scalar_lea.hbm %s966_s25, 128 }
  0x37   : > { %p702_p0 = scmp.ne.s32.totalorder %s966_s25, %s701_s8  ;;  %p703_p3 = pneg %p972_p13 }
  0x38   : > { %s706_s17 = scalar_lea.hbm %s1079_s0, 256  ;;  %p707_p9 = scmp.lt.u32.totalorder %s966_s25, %s1079_s0 }
  0x39   : > { %p704_p5 = pnand %p703_p3, %p702_p0  ;;  %p708_p1 = scmp.lt.u32.totalorder %s706_s17, %s701_s8 }
  0x3a   : > { %p710_p4 = scmp.lt.u32.totalorder %s701_s8, %s966_s25 }
  0x3b   : > { %p705_p7 = pneg %p704_p5  ;;  %p709_p2 = por %p708_p1, %p707_p9 }
  0x3d   : > { %p711_p6 = por %p710_p4, %p709_p2 }
  0x3f   : > { %p712_p8 = pnand %p711_p6, %p705_p7 }
  0x41   : > { %715 = shalt.err (!%p712_p8)
}
  0x42   : > { %s716_s7 = scalar_lea.vmem %s968_s6, 128  ;;  %s822_s27 = smov [#allocation2]  }
  0x43   : > { %p717_p12 = scmp.ne.s32.totalorder %s968_s6, %s716_s7  ;;  %s721_s14 = sshll.u32 %s822_s27, 4  ;;  %s722_s14 = int_to_ptr.vmem [resolvable:$false] %s721_s14 }
  0x44   : > { %s723_s16 = scalar_lea.vmem %s722_s14, 256  ;;  %p724_p5 = scmp.lt.s32.totalorder %s968_s6, %s722_s14 }
  0x45   : > { %p719_p11 = pnand %p717_p12, %p703_p3  ;;  %p725_p9 = scmp.lt.s32.totalorder %s723_s16, %s716_s7 }
  0x47   : > { %p720_p0 = pneg %p719_p11  ;;  %p726_p1 = por %p725_p9, %p724_p5 }
  0x49   : > { %p727_p2 = pnand %p726_p1, %p720_p0 }
  0x4b   : > { %730 = shalt.err (!%p727_p2)
}
  0x4c   : > { %608 = dma.hbm_to_vmem [thread:$0]  (!%p972_p13), %s966_s25, 128, %s968_s6, %s231_s11  }
  0x4d   : > { %p1099_p7 = scmp.ne.s32.totalorder %s1093_s30, 0 }
  0x4e   : > { %s1004_s8 = sand.u32 (!%p1099_p7), 1, %s801_s19   ;;  %p1100_p3 = scmp.ne.s32.totalorder (!%p1099_p7), %s1091_s28, 0 }
  0x4f   : > { %250 = sbr.rel (%p1099_p7) target bundleno = 502 (0x1f6), region = 40  ;;  %s573_s17 = sshll.u32 (!%p1099_p7), %s1004_s8, 3 }
  0x50   : > { %s253_s12 = scalar_lea.sflag (!%p1099_p7), [#allocation3], %s1004_s8  ;;  %s256_s24 = scalar_lea.vmem (!%p1099_p7), [#allocation2], %s573_s17 }
  0x56   : > { %784 = dma.done.wait (%p1100_p3), %s253_s12, 128  }
  0x57   : > { %786 = vsyncadd (%p1100_p3), %s253_s12, 4294967168  ;;  %p1101_p4 = scmp.ne.s32.totalorder %s1089_s26, 0 }
  0x59   : > { %788 = dma.done.wait (%p1101_p4), [#allocation6], 1024  }
  0x5a   : > { %790 = vsyncadd (%p1101_p4), [#allocation6], 4294966272  ;;  %v823_v0 = vmov 0.0   ;;  %v300_v1 = vld [vmem:[#allocation5 + $0x8] sm:$0xff]  ;;  %v302_v2 = vld [vmem:[#allocation5 + $0x18] sm:$0xff]  ;;  %vm319_vm0 = vcmask 261120   ;;  %v309_v14 = vlaneseq }
  0x5b   : > { %387 = vmatprep.mubr.f32.mxu0 %v823_v0  ;;  %v299_v3 = vld [vmem:[#allocation5] sm:$0xff]  ;;  %v585_v4 = vpack.c.bf16 %v302_v2, %v300_v1  ;;  %v301_v5 = vld [vmem:[#allocation5 + $0x10] sm:$0xff]  ;;  %v304_v6 = vld [vmem:[#allocation5 + $0x28] sm:$0xff]  ;;  %s575_s6 = sshll.u32 %s1004_s8, 4  ;;  %s584_s7 = sshll.u32 %s809_s21, 8 }
  0x5c   : > { %v306_v7 = vld [vmem:[#allocation5 + $0x38] sm:$0xff]  ;;  %v587_v8 = vpack.c.bf16 %v301_v5, %v299_v3  ;;  %v303_v10 = vld [vmem:[#allocation5 + $0x20] sm:$0xff]  ;;  %v305_v11 = vld [vmem:[#allocation5 + $0x30] sm:$0xff]  ;;  %v310_v15 = vshrl.u32 %v309_v14, 7  ;;  %s290_s27 = scalar_lea.vmem [#allocation7], %s575_s6  ;;  %s1030_s12 = scalar_lea.hbm %s1084_s5, %s584_s7 }
  0x5d   : > { %v589_v9 = vpack.c.bf16 %v306_v7, %v304_v6  ;;  %586 = vmatprep.subr.bf16.mxu0 %v585_v4  ;;  %v591_v12 = vpack.c.bf16 %v305_v11, %v303_v10  ;;  %v298_v13 = vld [vmem:[%s256_s24] sm:$0xff]  ;;  %s459_s14 = sshll.u32 %s290_s27, 4  ;;  %s443_s24 = scalar_lea.sflag [#allocation4], %s1004_s8  ;;  %s1032_s14 = int_to_ptr.vmem [resolvable:$true] %s459_s14 }
  0x5e   : > { %588 = vmatpush1.bf16.msra.mxu0 %v587_v8  ;;  %v311_v16 = vsub.s32 0, %v310_v15  ;;  %v307_v17 = vld [vmem:[%s1081_s2] sm:$0x3]  ;;  %v315_v18 = vsub.s32 1, %v310_v15  ;;  %s731_s26 = scalar_lea.vmem %s1032_s14, 256  ;;  %s824_s21 = smov [#allocation7]  }
  0x5f   : > { %590 = vmatprep.subr.bf16.mxu0 %v589_v9  ;;  %v577_v45 = vld [vmem:[%s1082_s3] ss:$0 sm:$0xff]  ;;  %p732_p13 = scmp.ne.s32.totalorder %s1032_s14, %s731_s26  ;;  %s735_s28 = sshll.u32 %s824_s21, 4  ;;  %s736_s28 = int_to_ptr.vmem [resolvable:$false] %s735_s28 }
  0x60   : > { %v312_v19 = vrot.slane %v307_v17, %v311_v16  ;;  %v316_v20 = vrot.slane %v307_v17, %v315_v18  ;;  %v578_v47 = vld [vmem:[%s1083_s4] ss:$0 sm:$0xff]  ;;  %s737_s30 = scalar_lea.vmem %s736_s28, 512  ;;  %p738_p12 = scmp.lt.s32.totalorder %s1032_s14, %s736_s28 }
  0x61   : > { %p733_p6 = pnand %p732_p13, %p951_p10  ;;  %p739_p11 = scmp.lt.s32.totalorder %s737_s30, %s731_s26 }
  0x62   : > { %592 = vmatpush1.bf16.msra.mxu0 %v591_v12 }
  0x63   : > { %p734_p8 = pneg %p733_p6  ;;  %p740_p0 = por %p739_p11, %p738_p12 }
  0x65   : > { %576 = vmatmul.mubr.msk.f32.vlgmr.msra.gmra.mrb[0].mxu0 %vm319_vm0, %v298_v13  ;;  %p741_p5 = pnand %p740_p0, %p734_p8 }
 0x138   : > { %v389_v21 = vpop.f32.mrb[0].mxu0 }
 0x139   : > { %v390_v22 = vadd.f32 %v389_v21, %v312_v19  ;;  %v391_v23 = vpop.f32.mrb[1].mxu0 }
 0x13a   : > { %v392_v24 = vadd.f32 %v391_v23, %v316_v20 }
 0x13b   : > { %396 = vadd.xlane.f32.xlu0 %v390_v22  ;;  %v398_v25 = vmul.f32 %v390_v22, %v390_v22 }
 0x13c   : > { %v427_v26 = vmul.f32 %v392_v24, %v392_v24 }
 0x13d   : > { %399 = vadd.xlane.f32.xlu1 %v398_v25 }
 0x13f   : > { %425 = vadd.xlane.f32.xlu0 %v392_v24 }
 0x141   : > { %428 = vadd.xlane.f32.xlu1 %v427_v26 }
 0x1c8   : > { %v397_v27 = vpop.xlane.xlu0 %396 }
 0x1c9   : > { %v401_v28 = vmul.f32 0.0078125, %v397_v27 }
 0x1ca   : > { %v400_v29 = vpop.xlane.xlu1 %399 }
 0x1cb   : > { %v403_v30 = vmul.f32 %v401_v28, %v401_v28  ;;  %v402_v31 = vmul.f32 0.0078125, %v400_v29  ;;  %v406_v43 = vsub.f32 %v390_v22, %v401_v28 }
 0x1cc   : > { %v426_v32 = vpop.xlane.xlu0 %425 }
 0x1cd   : > { %v404_v33 = vsub.f32 %v402_v31, %v403_v30  ;;  %v430_v34 = vmul.f32 0.0078125, %v426_v32 }
 0x1ce   : > { %v429_v35 = vpop.xlane.xlu1 %428 }
 0x1cf   : > { %v405_v36 = vmax.f32 %v404_v33, 0.0  ;;  %v432_v37 = vmul.f32 %v430_v34, %v430_v34  ;;  %v431_v38 = vmul.f32 0.0078125, %v429_v35  ;;  %v435_v48 = vsub.f32 %v392_v24, %v430_v34 }
 0x1d1   : > { %v407_v39 = vadd.f32 1e-05, %v405_v36  ;;  %v433_v40 = vsub.f32 %v431_v38, %v432_v37 }
 0x1d3   : > { %669 = vrsqrt.f32 %v407_v39  ;;  %v434_v41 = vmax.f32 %v433_v40, 0.0 }
 0x1d5   : > { %v436_v42 = vadd.f32 1e-05, %v434_v41 }
 0x1d7   : > { %671 = vrsqrt.f32 %v436_v42 }
 0x1dd   : > { %v670_v44 = vpop.eup %669 }
 0x1de   : > { %v409_v46 = vmul.f32 %v670_v44, %v406_v43 }
 0x1e0   : > { %v416_v49 = vmul.f32 %v577_v45, %v409_v46 }
 0x1e1   : > { %v672_v50 = vpop.eup %671 }
 0x1e2   : > { %v438_v51 = vmul.f32 %v672_v50, %v435_v48  ;;  %v423_v52 = vadd.f32 %v578_v47, %v416_v49 }
 0x1e4   : > { %424 = vst [vmem:[%s290_s27] sm:$0xff] %v423_v52  ;;  %v439_v53 = vmul.f32 %v577_v45, %v438_v51 }
 0x1e6   : > { %v440_v54 = vadd.f32 %v578_v47, %v439_v53 }
 0x1e8   : > { %441 = vst [vmem:[%s290_s27 + $0x8] sm:$0xff] %v440_v54 }
 0x1e9   : > { %744 = shalt.err (!%p741_p5)
}
 0x1ea   : > { %s745_s8 = scalar_lea.hbm %s1030_s12, 256  ;;  %s749_s10 = scalar_lea.hbm %s1084_s5, 512 }
 0x1eb   : > { %p746_p9 = scmp.ne.s32.totalorder %s1030_s12, %s745_s8  ;;  %p750_p7 = scmp.lt.u32.totalorder %s1030_s12, %s1084_s5 }
 0x1ec   : > { %p751_p3 = scmp.lt.u32.totalorder %s749_s10, %s745_s8  ;;  %p753_p13 = scmp.lt.u32.totalorder %s745_s8, %s1030_s12 }
 0x1ed   : > { %p747_p1 = pnand %p746_p9, %p951_p10 }
 0x1ee   : > { %p752_p4 = por %p751_p3, %p750_p7 }
 0x1ef   : > { %p748_p2 = pneg %p747_p1 }
 0x1f0   : > { %p754_p6 = por %p753_p13, %p752_p4 }
 0x1f2   : > { %p755_p8 = pnand %p754_p6, %p748_p2 }
 0x1f4   : > { %758 = shalt.err (!%p755_p8)
}
 0x1f5   : > { %599 = dma.vmem_to_hbm [thread:$0]  (%p951_p10), %s1032_s14, 256, %s1030_s12, %s443_s24  }
 0x1f6 PF: > { %s471_s27 = sand.u32 1, %s797_s18   ;;  %p1102_p12 = scmp.ne.s32.totalorder %s1092_s29, 0 }
 0x1f7   : > { %p1103_p11 = scmp.ge.s32.totalorder %s817_s23, 2  ;;  %s472_s16 = scalar_lea.sflag [#allocation4], %s471_s27 }
 0x1f9   : > { %p610_p0 = pnand %p1103_p11, %p1102_p12 }
 0x1fb   : > { %792 = dma.done.wait (!%p610_p0), %s472_s16, 256  }
 0x1fc   : > { %794 = vsyncadd (!%p610_p0), %s472_s16, 4294967040  ;;  %s22_s23 = sadd.s32 1, %s817_s23   ;;  %s1104_s18 = smov %s801_s19 }
 0x1fd   : > { %p19_p5 = scmp.ge.s32.totalorder %s22_s23, 4   ;;  %s1105_s19 = smov %s805_s20 }
 0x1fe   : > { %s1106_s20 = smov %s960_s15  ;;  %s1107_s21 = smov %s813_s22 }
 0x1ff   : > { %s1108_s22 = smov %s1110_s9  ;;  %21 = sbr.rel (!%p19_p5) target bundleno = 7 (0x7), region = 93 }
 0x206   :  { %477 = vsyncpa [#allocation3], 1 }
 0x207   :  { %479 = vsyncpa [#allocation3 + $0x1], 1 }
 0x208   :  { %480 = vsyncpa [#allocation6], 1 }
 0x209   :  { %481 = vsyncpa [#allocation4], 1 }
 0x20a   :  { %483 = vsyncpa [#allocation4 + $0x1], 1 }

</bundles_post_ra>
